<compile_context>
chip_gen: v6e
topology: v6e:2x2x1
jax: 0.10.0
libtpu: 0.0.40
codegen_flags: <defaults>
</compile_context>

<pallas_src>
import functools

import jax
import jax.numpy as jnp
from jax import lax
from jax.experimental import pallas as pl
from jax.experimental.pallas import tpu as pltpu


# ----------------------------------------------------------------------------
# Generation-aware sizing (v5e/v6e: 128 MiB VMEM per core, v7x: 64 MiB).
# ----------------------------------------------------------------------------
def _tpu_vmem_capacity_bytes():
    try:
        cap = int(getattr(pltpu.get_tpu_info(), "vmem_capacity_bytes", 0))
        if cap > 0:
            return cap
    except Exception:
        pass
    return 64 * 1024 * 1024          # conservative fallback (v7x-sized)


_VMEM_CAP = _tpu_vmem_capacity_bytes()
_VMEM_LIMIT = min(int(_VMEM_CAP * 3 // 4), 100 * 1024 * 1024)
_MAX_TILE_S = 128 if _VMEM_CAP <= 64 * 1024 * 1024 else 256


def _pick_tile(total, max_tile):
    """Largest tile <= max_tile that divides `total` and is TPU-legal
    (a multiple of 8, or the full extent)."""
    if total <= max_tile:
        return total
    t = max_tile - (max_tile % 8)
    while t >= 8:
        if total % t == 0:
            return t
        t -= 8
    return total


# ----------------------------------------------------------------------------
# Kernel 1: furthest point sampling (sequential greedy argmax chain), one grid
# step per batch; point cloud (3, N) and min-distance vector stay in VMEM.
# ----------------------------------------------------------------------------
def _fps_kernel(npoint, x_ref, idx_ref, dist_ref):
    x = x_ref[0]                                       # (3, N) f32
    n = x.shape[1]
    iota_n = lax.broadcasted_iota(jnp.int32, (1, n), 1)
    iota_s = lax.broadcasted_iota(jnp.int32, (1, npoint), 1)
    dist_ref[...] = jnp.full((1, n), 1e10, jnp.float32)

    def body(i, carry):
        out_vec, last = carry
        sel = iota_n == last                           # one-hot of previous pick
        px = jnp.sum(jnp.where(sel, x[0:1, :], 0.0))
        py = jnp.sum(jnp.where(sel, x[1:2, :], 0.0))
        pz = jnp.sum(jnp.where(sel, x[2:3, :], 0.0))
        d = (x[0:1, :] - px) ** 2 + (x[1:2, :] - py) ** 2 + (x[2:3, :] - pz) ** 2
        nd = jnp.minimum(dist_ref[...], d)
        dist_ref[...] = nd
        m = jnp.max(nd)
        nxt = jnp.min(jnp.where(nd == m, iota_n, n)).astype(jnp.int32)
        out_vec = jnp.where(iota_s == i, nxt, out_vec)
        return out_vec, nxt

    out0 = jnp.zeros((1, npoint), jnp.int32)           # index 0 is the seed point
    out_vec, _ = lax.fori_loop(1, npoint, body, (out0, jnp.int32(0)))
    idx_ref[0] = out_vec


def furthest_point_sample(xyz, npoint):
    """xyz: (B, 3, N) -> (B, npoint) int32 indices (first index is 0)."""
    B, _, N = xyz.shape
    out = pl.pallas_call(
        functools.partial(_fps_kernel, npoint),
        out_shape=jax.ShapeDtypeStruct((B, 1, npoint), jnp.int32),
        grid=(B,),
        in_specs=[pl.BlockSpec((1, 3, N), lambda b: (b, 0, 0))],
        out_specs=pl.BlockSpec((1, 1, npoint), lambda b: (b, 0, 0)),
        scratch_shapes=[pltpu.VMEM((1, N), jnp.float32)],
        compiler_params=pltpu.CompilerParams(
            dimension_semantics=("parallel",),
            vmem_limit_bytes=_VMEM_LIMIT),
    )(xyz)
    return out.reshape(B, npoint)


# ----------------------------------------------------------------------------
# Kernel 2: fused squared-distance + ball-query neighbor selection
#   queries  : (B, S, 3)  channels-last (tiny lane pad, small tensor)
#   database : (B, 3, N)  original layout -> N on lanes, no padding
#   output   : (B, S, K)  int32 neighbor indices
# ----------------------------------------------------------------------------
def _ball_query_kernel(nsample, radius_sq, q_ref, x_ref, idx_ref):
    q = q_ref[0]                          # (TQ, 3)
    x = x_ref[0]                          # (3, N)
    n = x.shape[1]

    # Squared distances via 3 broadcasted VPU FMAs (no MXU, no transposes).
    acc = jnp.zeros((q.shape[0], n), jnp.float32)
    for c in range(3):
        d = q[:, c:c + 1] - x[c:c + 1, :]
        acc = acc + d * d

    # First `nsample` in-radius indices (ascending index order), padded with
    # the first hit when fewer than `nsample` neighbors are in radius (CUDA
    # ball_query semantics).
    # TODO(synk): chunk N inside the kernel (fori over ~512-lane chunks with an
    # early-exit once all queries have nsample hits) to bound XLU reduce width.
    iota = lax.broadcasted_iota(jnp.int32, acc.shape, 1)
    cand = jnp.where(acc < radius_sq, iota, n)
    picks = []
    for _ in range(nsample):
        m = jnp.min(cand, axis=-1, keepdims=True)       # (TQ, 1)
        picks.append(m)
        cand = jnp.where(cand == m, n, cand)
    sel = jnp.concatenate(picks, axis=-1)               # (TQ, nsample)
    first = sel[:, 0:1]
    sel = jnp.where(sel >= n, first, sel)
    # Guard: if a query had zero in-radius neighbors, `first` is the sentinel n
    # itself; clamp so the downstream gather stays in bounds (matches clamping
    # gather semantics; FPS centroids always have a self-hit, so this is rare).
    idx_ref[0] = jnp.minimum(sel, n - 1)


def ball_query(new_xyz_t, xyz, radius, nsample, *, tile_q=None):
    """new_xyz_t: (B, S, 3) queries, xyz: (B, 3, N) database -> (B, S, K) idx."""
    B, S, _ = new_xyz_t.shape
    N = xyz.shape[2]
    # Small query tile: the selection loop keeps (TQ, N) slabs live; large TQ
    # just creates vreg spill traffic without reducing total VPU/XLU work.
    target_tq = max(8, min(32, (128 // max(1, nsample)) // 8 * 8))
    tq = tile_q or _pick_tile(S, target_tq)
    kernel = functools.partial(_ball_query_kernel, nsample, float(radius) ** 2)
    return pl.pallas_call(
        kernel,
        out_shape=jax.ShapeDtypeStruct((B, S, nsample), jnp.int32),
        grid=(B, S // tq),
        in_specs=[pl.BlockSpec((1, tq, 3), lambda b, s: (b, s, 0)),
                  pl.BlockSpec((1, 3, N), lambda b, s: (b, 0, 0))],
        out_specs=pl.BlockSpec((1, tq, nsample), lambda b, s: (b, s, 0)),
        compiler_params=pltpu.CompilerParams(
            dimension_semantics=("parallel", "parallel"),
            vmem_limit_bytes=_VMEM_LIMIT),
    )(new_xyz_t, xyz)


# ----------------------------------------------------------------------------
# Kernel 3: MLP over grouped neighborhoods (1x1 conv with folded BN + ReLU
#           stack) followed by max-pool over the nsample axis.
#           Tiled over (batch, npoint tiles); both axes "parallel".
# ----------------------------------------------------------------------------
def _sa_mlp_kernel(num_layers, grouped_ref, *rest):
    out_ref = rest[-1]
    layer_refs = rest[:-1]                # 2 * num_layers refs: [w, bias]

    h = grouped_ref[0]                    # (TS, K, 3 + C), bf16
    for i in range(num_layers):
        w = layer_refs[2 * i][...]        # (Cin_i, Cout_i) bf16 (BN scale folded)
        b = layer_refs[2 * i + 1][...]    # (1, Cout_i) f32 (folded BN bias)
        # 1x1 conv == channel matmul; bf16 operands, f32 accumulation on MXU.
        # TODO(synk): compute the tiny-Cin first layer with broadcasted VPU FMAs
        # instead of a degenerate depth-(3+C) MXU contraction.
        acc = jnp.einsum('nkc,cd->nkd', h, w, preferred_element_type=jnp.float32)
        acc = jnp.maximum(acc + b, 0.0)   # folded BN bias + ReLU
        # Keep bf16 activations between layers; last layer stays f32.
        h = acc if i == num_layers - 1 else acc.astype(jnp.bfloat16)
    out_ref[0] = jnp.max(h, axis=1).astype(out_ref.dtype)   # max over nsample


def sa_mlp(grouped, weights, biases, *, tile_s=None):
    """grouped: (B, S, K, 3 + C) channels-last bf16 -> (B, S, mlp[-1]) f32."""
    B, S, K, Cin = grouped.shape
    weights = list(weights)
    biases = list(biases)
    num_layers = len(weights)
    c_out = weights[-1].shape[1]

    # Lane-dense writeback: zero-pad the last layer's output channels up to a
    # multiple of 128 (padded channels are ReLU(0)=0 and sliced off below).
    c_pad = c_out if c_out % 128 == 0 else ((c_out + 127) // 128) * 128
    if c_pad != c_out:
        weights[-1] = jnp.pad(weights[-1], ((0, 0), (0, c_pad - c_out)))
        biases[-1] = jnp.pad(biases[-1], ((0, 0), (0, c_pad - c_out)))

    # v7x (64 MiB VMEM, 2 TCs) -> smaller tiles / more grid steps; v5e/v6e -> 256.
    ts = tile_s or _pick_tile(S, _MAX_TILE_S)

    inputs = [grouped]
    in_specs = [pl.BlockSpec((1, ts, K, Cin), lambda b, s: (b, s, 0, 0))]
    for i in range(num_layers):
        inputs += [weights[i], biases[i]]
        in_specs += [
            pl.BlockSpec(weights[i].shape, lambda b, s: (0, 0)),
            pl.BlockSpec(biases[i].shape, lambda b, s: (0, 0)),
        ]

    kernel = functools.partial(_sa_mlp_kernel, num_layers)
    out = pl.pallas_call(
        kernel,
        out_shape=jax.ShapeDtypeStruct((B, S, c_pad), jnp.float32),
        grid=(B, S // ts),
        in_specs=in_specs,
        out_specs=pl.BlockSpec((1, ts, c_pad), lambda b, s: (b, s, 0)),
        compiler_params=pltpu.CompilerParams(
            dimension_semantics=("parallel", "parallel"),
            vmem_limit_bytes=_VMEM_LIMIT),
    )(*inputs)
    return out[..., :c_out] if c_pad != c_out else out


# ----------------------------------------------------------------------------
# Parameters (deterministic, in-script): Conv2d 1x1 (no bias) + inference BN
# ----------------------------------------------------------------------------
def init_params(key, in_channel, mlp, eps=1e-5):
    last = in_channel + 3
    weights, scales, biases = [], [], []
    for out_c in mlp:
        kw, kg, kb, km, kv, key = jax.random.split(key, 6)
        # torch Conv2d weight (out_c, last, 1, 1) -> channels-last matmul (last, out_c)
        w = (jax.random.normal(kw, (out_c, last), jnp.float32)
             * (1.0 / jnp.sqrt(last))).T
        gamma = 1.0 + 0.1 * jax.random.normal(kg, (out_c,), jnp.float32)
        beta = 0.1 * jax.random.normal(kb, (out_c,), jnp.float32)
        rmean = 0.1 * jax.random.normal(km, (out_c,), jnp.float32)
        rvar = jnp.abs(1.0 + 0.1 * jax.random.normal(kv, (out_c,), jnp.float32))
        scale = gamma / jnp.sqrt(rvar + eps)
        bias = beta - rmean * scale
        weights.append(w)
        scales.append(scale.reshape(1, out_c))
        biases.append(bias.reshape(1, out_c))
        last = out_c
    return weights, scales, biases


# ----------------------------------------------------------------------------
# Plain-JAX glue: neighbor gather
# ----------------------------------------------------------------------------
def _gather_rows(points_t, idx):
    # points_t: (B, N, D), idx: (B, ...) -> (B, ..., D)
    return jax.vmap(lambda p, i: p[i])(points_t, idx)


# ----------------------------------------------------------------------------
# Full forward (PyTorch-layout interface)
# ----------------------------------------------------------------------------
def pointnet_sa_forward(xyz, points, params, npoint, radius, nsample,
                        group_all=False, *, tile_s=None, tile_q=None):
    """xyz: (B, 3, N), points: (B, C, N) (PyTorch layout).
    Returns (new_xyz (B, 3, npoint), new_points (B, mlp[-1], npoint))."""
    if group_all:
        # TODO(synk): GroupAll (group_all=True) branch not implemented.
        raise NotImplementedError("group_all=True path not implemented")

    weights, scales, biases = params
    xyz = xyz.astype(jnp.float32)
    xyz_t = jnp.transpose(xyz, (0, 2, 1))                            # (B, N, 3)
    points_t = jnp.transpose(points, (0, 2, 1)).astype(jnp.float32)  # (B, N, C)

    # Fold BN scale into the conv weight (scale per output channel) and pre-cast
    # the MXU operands to bf16 once, outside the kernel.
    w_bf16 = [(w * s).astype(jnp.bfloat16) for w, s in zip(weights, scales)]
    b_f32 = [b.astype(jnp.float32) for b in biases]

    # Furthest point sampling (Pallas kernel 1) + gather of sampled centroids.
    fps_idx = furthest_point_sample(xyz, npoint)                     # (B, S)
    new_xyz_t = _gather_rows(xyz_t, fps_idx)                         # (B, S, 3)
    new_xyz = jnp.transpose(new_xyz_t, (0, 2, 1))                    # (B, 3, S)

    # Fused distance + ball-query neighbor selection (Pallas kernel 2).
    idx = ball_query(new_xyz_t, xyz, radius, nsample, tile_q=tile_q)  # (B, S, K)

    # Neighbor gather + channel packing (plain-JAX index plumbing), bf16 slab
    # to halve HBM write+read traffic of the dominant stream.
    # TODO(synk): fuse this gather into sa_mlp (scalar-prefetched idx + in-kernel
    # gather) to remove the grouped-slab HBM round-trip entirely.
    grouped_xyz = _gather_rows(xyz_t, idx) - new_xyz_t[:, :, None, :]  # rel coords
    grouped_pts = _gather_rows(points_t, idx)                          # (B, S, K, C)
    grouped = jnp.concatenate([grouped_xyz, grouped_pts],
                              axis=-1).astype(jnp.bfloat16)            # (B, S, K, 3+C)

    # MLP + max-pool over nsample (Pallas kernel 3).
    new_points = sa_mlp(grouped, w_bf16, b_f32, tile_s=tile_s)       # (B, S, D')
    new_points = jnp.transpose(new_points, (0, 2, 1))                # (B, D', S)
    return new_xyz, new_points


if __name__ == "__main__":
    B, C, N = 2, 4, 64           # batch, in_channel, num input points
    npoint, radius, nsample = 16, 0.8, 8
    mlp = [16, 32]

    key = jax.random.PRNGKey(0)
    kx, kp, kparam = jax.random.split(key, 3)
    xyz = jax.random.normal(kx, (B, 3, N), jnp.float32)
    points = jax.random.normal(kp, (B, C, N), jnp.float32)

    params = init_params(kparam, C, mlp)

    # Small tiles so the demo exercises the (batch, npoint-tile) grid.
    fwd = jax.jit(functools.partial(
        pointnet_sa_forward, npoint=npoint, radius=radius, nsample=nsample,
        tile_s=8, tile_q=8))
    new_xyz, new_points = fwd(xyz, points, params)
    jax.block_until_ready((new_xyz, new_points))

    assert new_xyz.shape == (B, 3, npoint)
    assert new_points.shape == (B, mlp[-1], npoint)
    assert bool(jnp.all(jnp.isfinite(new_points)))
    print("KERNEL_OK")
</pallas_src>

<mosaic_0001>
module attributes {stable_mosaic.version = 11 : i64} {
  func.func @_fps_kernel(%arg0: i32, %arg1: memref<1x3x64xf32, #tpu.memory_space<vmem>>, %arg2: memref<1x1x16xi32, #tpu.memory_space<vmem>>, %arg3: memref<1x64xf32, #tpu.memory_space<vmem>>) attributes {dimension_semantics = [#tpu.dimension_semantics<parallel>], iteration_bounds = array<i64: 2>, scalar_prefetch = 0 : i64, scratch_operands = 1 : i64, tpu.core_type = #tpu.core_type<tc>, window_params = [{transform_indices = @transform_0, window_bounds = array<i64: 1, 3, 64>}, {transform_indices = @transform_1, window_bounds = array<i64: 1, 1, 16>}]} {
    %c0 = arith.constant 0 : index
    %c0_0 = arith.constant 0 : index
    %c0_1 = arith.constant 0 : index
    %0 = vector.load %arg1[%c0, %c0_0, %c0_1] : memref<1x3x64xf32, #tpu.memory_space<vmem>>, vector<1x3x64xf32>
    %1 = vector.shape_cast %0 : vector<1x3x64xf32> to vector<3x64xf32>
    %2 = tpu.iota {dimensions = array<i32: 1>} : vector<1x64xi32>
    %3 = tpu.iota {dimensions = array<i32: 1>} : vector<1x16xi32>
    %cst = arith.constant 1.000000e+10 : f32
    %4 = vector.broadcast %cst : f32 to vector<1x64xf32>
    %c0_2 = arith.constant 0 : index
    %c0_3 = arith.constant 0 : index
    %5 = vector.load %arg3[%c0_2, %c0_3] : memref<1x64xf32, #tpu.memory_space<vmem>>, vector<1x64xf32>
    tpu.vector_store %arg3[%c0_2, %c0_3], %4 {strides = array<i32>} : memref<1x64xf32, #tpu.memory_space<vmem>>, vector<1x64xf32>,
    %c0_i32 = arith.constant 0 : i32
    %6 = vector.broadcast %c0_i32 : i32 to vector<1x16xi32>
    %c0_i32_4 = arith.constant 0 : i32
    %c1_i32 = arith.constant 1 : i32
    %c15_i32 = arith.constant 15 : i32
    %7 = arith.addi %c1_i32, %c15_i32 : i32
    %c1_i32_5 = arith.constant 1 : i32
    %8:2 = scf.for %arg4 = %c1_i32 to %7 step %c1_i32_5 iter_args(%arg5 = %6, %arg6 = %c0_i32_4) -> (vector<1x16xi32>, i32)  : i32 {
      %12 = vector.broadcast %arg6 : i32 to vector<1x64xi32>
      %13 = arith.cmpi eq, %2, %12 : vector<1x64xi32>
      %14 = vector.extract_strided_slice %1 {offsets = [0, 0], sizes = [1, 64], strides = [1, 1]} : vector<3x64xf32> to vector<1x64xf32>
      %cst_10 = arith.constant 0.000000e+00 : f32
      %15 = vector.broadcast %cst_10 : f32 to vector<1x64xf32>
      %16 = arith.select %13, %14, %15 : vector<1x64xi1>, vector<1x64xf32>
      %17 = vector.shape_cast %16 : vector<1x64xf32> to vector<1x1x64xf32>
      %cst_11 = arith.constant dense<0.000000e+00> : vector<1xf32>
      %18 = vector.multi_reduction <add>, %17, %cst_11 [1, 2] : vector<1x1x64xf32> to vector<1xf32>
      %19 = vector.shape_cast %18 : vector<1xf32> to vector<1x1x1xf32>
      %20 = vector.extract %19[0, 0, 0] : f32 from vector<1x1x1xf32>
      %21 = vector.extract_strided_slice %1 {offsets = [1, 0], sizes = [1, 64], strides = [1, 1]} : vector<3x64xf32> to vector<1x64xf32>
      %cst_12 = arith.constant 0.000000e+00 : f32
      %22 = vector.broadcast %cst_12 : f32 to vector<1x64xf32>
      %23 = arith.select %13, %21, %22 : vector<1x64xi1>, vector<1x64xf32>
      %24 = vector.shape_cast %23 : vector<1x64xf32> to vector<1x1x64xf32>
      %cst_13 = arith.constant dense<0.000000e+00> : vector<1xf32>
      %25 = vector.multi_reduction <add>, %24, %cst_13 [1, 2] : vector<1x1x64xf32> to vector<1xf32>
      %26 = vector.shape_cast %25 : vector<1xf32> to vector<1x1x1xf32>
      %27 = vector.extract %26[0, 0, 0] : f32 from vector<1x1x1xf32>
      %28 = vector.extract_strided_slice %1 {offsets = [2, 0], sizes = [1, 64], strides = [1, 1]} : vector<3x64xf32> to vector<1x64xf32>
      %cst_14 = arith.constant 0.000000e+00 : f32
      %29 = vector.broadcast %cst_14 : f32 to vector<1x64xf32>
      %30 = arith.select %13, %28, %29 : vector<1x64xi1>, vector<1x64xf32>
      %31 = vector.shape_cast %30 : vector<1x64xf32> to vector<1x1x64xf32>
      %cst_15 = arith.constant dense<0.000000e+00> : vector<1xf32>
      %32 = vector.multi_reduction <add>, %31, %cst_15 [1, 2] : vector<1x1x64xf32> to vector<1xf32>
      %33 = vector.shape_cast %32 : vector<1xf32> to vector<1x1x1xf32>
      %34 = vector.extract %33[0, 0, 0] : f32 from vector<1x1x1xf32>
      %35 = vector.extract_strided_slice %1 {offsets = [0, 0], sizes = [1, 64], strides = [1, 1]} : vector<3x64xf32> to vector<1x64xf32>
      %36 = vector.broadcast %20 : f32 to vector<1x64xf32>
      %37 = arith.subf %35, %36 : vector<1x64xf32>
      %38 = arith.mulf %37, %37 : vector<1x64xf32>
      %39 = vector.extract_strided_slice %1 {offsets = [1, 0], sizes = [1, 64], strides = [1, 1]} : vector<3x64xf32> to vector<1x64xf32>
      %40 = vector.broadcast %27 : f32 to vector<1x64xf32>
      %41 = arith.subf %39, %40 : vector<1x64xf32>
      %42 = arith.mulf %41, %41 : vector<1x64xf32>
      %43 = arith.addf %38, %42 : vector<1x64xf32>
      %44 = vector.extract_strided_slice %1 {offsets = [2, 0], sizes = [1, 64], strides = [1, 1]} : vector<3x64xf32> to vector<1x64xf32>
      %45 = vector.broadcast %34 : f32 to vector<1x64xf32>
      %46 = arith.subf %44, %45 : vector<1x64xf32>
      %47 = arith.mulf %46, %46 : vector<1x64xf32>
      %48 = arith.addf %43, %47 : vector<1x64xf32>
      %c0_16 = arith.constant 0 : index
      %c0_17 = arith.constant 0 : index
      %49 = vector.load %arg3[%c0_16, %c0_17] : memref<1x64xf32, #tpu.memory_space<vmem>>, vector<1x64xf32>
      %50 = arith.minimumf %49, %48 : vector<1x64xf32>
      %c0_18 = arith.constant 0 : index
      %c0_19 = arith.constant 0 : index
      %51 = vector.load %arg3[%c0_18, %c0_19] : memref<1x64xf32, #tpu.memory_space<vmem>>, vector<1x64xf32>
      tpu.vector_store %arg3[%c0_18, %c0_19], %50 {strides = array<i32>} : memref<1x64xf32, #tpu.memory_space<vmem>>, vector<1x64xf32>,
      %52 = vector.shape_cast %50 : vector<1x64xf32> to vector<1x1x64xf32>
      %cst_20 = arith.constant dense<0xFF800000> : vector<1xf32>
      %53 = vector.multi_reduction <maximumf>, %52, %cst_20 [1, 2] : vector<1x1x64xf32> to vector<1xf32>
      %54 = vector.shape_cast %53 : vector<1xf32> to vector<1x1x1xf32>
      %55 = vector.extract %54[0, 0, 0] : f32 from vector<1x1x1xf32>
      %56 = vector.broadcast %55 : f32 to vector<1x64xf32>
      %57 = arith.cmpf oeq, %50, %56 : vector<1x64xf32>
      %c64_i32 = arith.constant 64 : i32
      %58 = vector.broadcast %c64_i32 : i32 to vector<1x64xi32>
      %59 = arith.select %57, %2, %58 : vector<1x64xi1>, vector<1x64xi32>
      %60 = vector.shape_cast %59 : vector<1x64xi32> to vector<1x1x64xi32>
      %cst_21 = arith.constant dense<2147483647> : vector<1xi32>
      %61 = vector.multi_reduction <minsi>, %60, %cst_21 [1, 2] : vector<1x1x64xi32> to vector<1xi32>
      %62 = vector.shape_cast %61 : vector<1xi32> to vector<1x1x1xi32>
      %63 = vector.extract %62[0, 0, 0] : i32 from vector<1x1x1xi32>
      %64 = vector.broadcast %arg4 : i32 to vector<1x16xi32>
      %65 = arith.cmpi eq, %3, %64 : vector<1x16xi32>
      %66 = vector.broadcast %63 : i32 to vector<1x16xi32>
      %67 = arith.select %65, %66, %arg5 : vector<1x16xi1>, vector<1x16xi32>
      scf.yield %67, %63 : vector<1x16xi32>, i32
    }
    %c15_i32_6 = arith.constant 15 : i32
    %c0_7 = arith.constant 0 : index
    %c0_8 = arith.constant 0 : index
    %c0_9 = arith.constant 0 : index
    %9 = vector.load %arg2[%c0_7, %c0_8, %c0_9] : memref<1x1x16xi32, #tpu.memory_space<vmem>>, vector<1x1x16xi32>
    %10 = vector.shape_cast %9 : vector<1x1x16xi32> to vector<1x16xi32>
    %11 = vector.shape_cast %8#0 : vector<1x16xi32> to vector<1x1x16xi32>
    tpu.vector_store %arg2[%c0_7, %c0_8, %c0_9], %11 {strides = array<i32>} : memref<1x1x16xi32, #tpu.memory_space<vmem>>, vector<1x1x16xi32>,
    return
  }
  func.func @transform_0(%arg0: i32) -> (i32, i32, i32) {
    %c0_i32 = arith.constant 0 : i32
    %c0_i32_0 = arith.constant 0 : i32
    %c0_i32_1 = arith.constant 0 : i32
    return %arg0, %c0_i32, %c0_i32_0 : i32, i32, i32
  }
  func.func @transform_1(%arg0: i32) -> (i32, i32, i32) {
    %c0_i32 = arith.constant 0 : i32
    %c0_i32_0 = arith.constant 0 : i32
    %c0_i32_1 = arith.constant 0 : i32
    return %arg0, %c0_i32, %c0_i32_0 : i32, i32, i32
  }
}

module attributes {stable_mosaic.version = 11 : i64} {
  func.func @_ball_query_kernel(%arg0: i32, %arg1: i32, %arg2: memref<1x8x3xf32, #tpu.memory_space<vmem>>, %arg3: memref<1x3x64xf32, #tpu.memory_space<vmem>>, %arg4: memref<1x8x8xi32, #tpu.memory_space<vmem>>) attributes {dimension_semantics = [#tpu.dimension_semantics<parallel>, #tpu.dimension_semantics<parallel>], iteration_bounds = array<i64: 2, 2>, scalar_prefetch = 0 : i64, scratch_operands = 0 : i64, tpu.core_type = #tpu.core_type<tc>, window_params = [{transform_indices = @transform_0, window_bounds = array<i64: 1, 8, 3>}, {transform_indices = @transform_1, window_bounds = array<i64: 1, 3, 64>}, {transform_indices = @transform_2, window_bounds = array<i64: 1, 8, 8>}]} {
    %c0 = arith.constant 0 : index
    %c0_0 = arith.constant 0 : index
    %c0_1 = arith.constant 0 : index
    %0 = vector.load %arg2[%c0, %c0_0, %c0_1] : memref<1x8x3xf32, #tpu.memory_space<vmem>>, vector<1x8x3xf32>
    %1 = vector.shape_cast %0 : vector<1x8x3xf32> to vector<8x3xf32>
    %c0_2 = arith.constant 0 : index
    %c0_3 = arith.constant 0 : index
    %c0_4 = arith.constant 0 : index
    %2 = vector.load %arg3[%c0_2, %c0_3, %c0_4] : memref<1x3x64xf32, #tpu.memory_space<vmem>>, vector<1x3x64xf32>
    %3 = vector.shape_cast %2 : vector<1x3x64xf32> to vector<3x64xf32>
    %cst = arith.constant 0.000000e+00 : f32
    %4 = vector.broadcast %cst : f32 to vector<8x64xf32>
    %5 = vector.extract_strided_slice %1 {offsets = [0, 0], sizes = [8, 1], strides = [1, 1]} : vector<8x3xf32> to vector<8x1xf32>
    %6 = vector.extract_strided_slice %3 {offsets = [0, 0], sizes = [1, 64], strides = [1, 1]} : vector<3x64xf32> to vector<1x64xf32>
    %7 = vector.broadcast %5 : vector<8x1xf32> to vector<8x64xf32>
    %8 = vector.broadcast %6 : vector<1x64xf32> to vector<8x64xf32>
    %9 = arith.subf %7, %8 : vector<8x64xf32>
    %10 = arith.mulf %9, %9 : vector<8x64xf32>
    %11 = arith.addf %4, %10 : vector<8x64xf32>
    %12 = vector.extract_strided_slice %1 {offsets = [0, 1], sizes = [8, 1], strides = [1, 1]} : vector<8x3xf32> to vector<8x1xf32>
    %13 = vector.extract_strided_slice %3 {offsets = [1, 0], sizes = [1, 64], strides = [1, 1]} : vector<3x64xf32> to vector<1x64xf32>
    %14 = vector.broadcast %12 : vector<8x1xf32> to vector<8x64xf32>
    %15 = vector.broadcast %13 : vector<1x64xf32> to vector<8x64xf32>
    %16 = arith.subf %14, %15 : vector<8x64xf32>
    %17 = arith.mulf %16, %16 : vector<8x64xf32>
    %18 = arith.addf %11, %17 : vector<8x64xf32>
    %19 = vector.extract_strided_slice %1 {offsets = [0, 2], sizes = [8, 1], strides = [1, 1]} : vector<8x3xf32> to vector<8x1xf32>
    %20 = vector.extract_strided_slice %3 {offsets = [2, 0], sizes = [1, 64], strides = [1, 1]} : vector<3x64xf32> to vector<1x64xf32>
    %21 = vector.broadcast %19 : vector<8x1xf32> to vector<8x64xf32>
    %22 = vector.broadcast %20 : vector<1x64xf32> to vector<8x64xf32>
    %23 = arith.subf %21, %22 : vector<8x64xf32>
    %24 = arith.mulf %23, %23 : vector<8x64xf32>
    %25 = arith.addf %18, %24 : vector<8x64xf32>
    %26 = tpu.iota {dimensions = array<i32: 1>} : vector<8x64xi32>
    %cst_5 = arith.constant 6.400000e-01 : f32
    %27 = vector.broadcast %cst_5 : f32 to vector<8x64xf32>
    %28 = arith.cmpf olt, %25, %27 : vector<8x64xf32>
    %c64_i32 = arith.constant 64 : i32
    %29 = vector.broadcast %c64_i32 : i32 to vector<8x64xi32>
    %30 = arith.select %28, %26, %29 : vector<8x64xi1>, vector<8x64xi32>
    %cst_6 = arith.constant dense<2147483647> : vector<8xi32>
    %31 = vector.multi_reduction <minsi>, %30, %cst_6 [1] : vector<8x64xi32> to vector<8xi32>
    %32 = vector.shape_cast %31 : vector<8xi32> to vector<8x1xi32>
    %33 = vector.broadcast %32 : vector<8x1xi32> to vector<8x64xi32>
    %34 = arith.cmpi eq, %30, %33 : vector<8x64xi32>
    %c64_i32_7 = arith.constant 64 : i32
    %35 = vector.broadcast %c64_i32_7 : i32 to vector<8x64xi32>
    %36 = arith.select %34, %35, %30 : vector<8x64xi1>, vector<8x64xi32>
    %cst_8 = arith.constant dense<2147483647> : vector<8xi32>
    %37 = vector.multi_reduction <minsi>, %36, %cst_8 [1] : vector<8x64xi32> to vector<8xi32>
    %38 = vector.shape_cast %37 : vector<8xi32> to vector<8x1xi32>
    %39 = vector.broadcast %38 : vector<8x1xi32> to vector<8x64xi32>
    %40 = arith.cmpi eq, %36, %39 : vector<8x64xi32>
    %c64_i32_9 = arith.constant 64 : i32
    %41 = vector.broadcast %c64_i32_9 : i32 to vector<8x64xi32>
    %42 = arith.select %40, %41, %36 : vector<8x64xi1>, vector<8x64xi32>
    %cst_10 = arith.constant dense<2147483647> : vector<8xi32>
    %43 = vector.multi_reduction <minsi>, %42, %cst_10 [1] : vector<8x64xi32> to vector<8xi32>
    %44 = vector.shape_cast %43 : vector<8xi32> to vector<8x1xi32>
    %45 = vector.broadcast %44 : vector<8x1xi32> to vector<8x64xi32>
    %46 = arith.cmpi eq, %42, %45 : vector<8x64xi32>
    %c64_i32_11 = arith.constant 64 : i32
    %47 = vector.broadcast %c64_i32_11 : i32 to vector<8x64xi32>
    %48 = arith.select %46, %47, %42 : vector<8x64xi1>, vector<8x64xi32>
    %cst_12 = arith.constant dense<2147483647> : vector<8xi32>
    %49 = vector.multi_reduction <minsi>, %48, %cst_12 [1] : vector<8x64xi32> to vector<8xi32>
    %50 = vector.shape_cast %49 : vector<8xi32> to vector<8x1xi32>
    %51 = vector.broadcast %50 : vector<8x1xi32> to vector<8x64xi32>
    %52 = arith.cmpi eq, %48, %51 : vector<8x64xi32>
    %c64_i32_13 = arith.constant 64 : i32
    %53 = vector.broadcast %c64_i32_13 : i32 to vector<8x64xi32>
    %54 = arith.select %52, %53, %48 : vector<8x64xi1>, vector<8x64xi32>
    %cst_14 = arith.constant dense<2147483647> : vector<8xi32>
    %55 = vector.multi_reduction <minsi>, %54, %cst_14 [1] : vector<8x64xi32> to vector<8xi32>
    %56 = vector.shape_cast %55 : vector<8xi32> to vector<8x1xi32>
    %57 = vector.broadcast %56 : vector<8x1xi32> to vector<8x64xi32>
    %58 = arith.cmpi eq, %54, %57 : vector<8x64xi32>
    %c64_i32_15 = arith.constant 64 : i32
    %59 = vector.broadcast %c64_i32_15 : i32 to vector<8x64xi32>
    %60 = arith.select %58, %59, %54 : vector<8x64xi1>, vector<8x64xi32>
    %cst_16 = arith.constant dense<2147483647> : vector<8xi32>
    %61 = vector.multi_reduction <minsi>, %60, %cst_16 [1] : vector<8x64xi32> to vector<8xi32>
    %62 = vector.shape_cast %61 : vector<8xi32> to vector<8x1xi32>
    %63 = vector.broadcast %62 : vector<8x1xi32> to vector<8x64xi32>
    %64 = arith.cmpi eq, %60, %63 : vector<8x64xi32>
    %c64_i32_17 = arith.constant 64 : i32
    %65 = vector.broadcast %c64_i32_17 : i32 to vector<8x64xi32>
    %66 = arith.select %64, %65, %60 : vector<8x64xi1>, vector<8x64xi32>
    %cst_18 = arith.constant dense<2147483647> : vector<8xi32>
    %67 = vector.multi_reduction <minsi>, %66, %cst_18 [1] : vector<8x64xi32> to vector<8xi32>
    %68 = vector.shape_cast %67 : vector<8xi32> to vector<8x1xi32>
    %69 = vector.broadcast %68 : vector<8x1xi32> to vector<8x64xi32>
    %70 = arith.cmpi eq, %66, %69 : vector<8x64xi32>
    %c64_i32_19 = arith.constant 64 : i32
    %71 = vector.broadcast %c64_i32_19 : i32 to vector<8x64xi32>
    %72 = arith.select %70, %71, %66 : vector<8x64xi1>, vector<8x64xi32>
    %cst_20 = arith.constant dense<2147483647> : vector<8xi32>
    %73 = vector.multi_reduction <minsi>, %72, %cst_20 [1] : vector<8x64xi32> to vector<8xi32>
    %74 = vector.shape_cast %73 : vector<8xi32> to vector<8x1xi32>
    %75 = tpu.concatenate %32, %38, %44, %50, %56, %62, %68, %74 in 1 : vector<8x1xi32>, vector<8x1xi32>, vector<8x1xi32>, vector<8x1xi32>, vector<8x1xi32>, vector<8x1xi32>, vector<8x1xi32>, vector<8x1xi32> -> vector<8x8xi32>
    %76 = vector.extract_strided_slice %75 {offsets = [0, 0], sizes = [8, 1], strides = [1, 1]} : vector<8x8xi32> to vector<8x1xi32>
    %c64_i32_21 = arith.constant 64 : i32
    %77 = vector.broadcast %c64_i32_21 : i32 to vector<8x8xi32>
    %78 = arith.cmpi sge, %75, %77 : vector<8x8xi32>
    %79 = vector.shape_cast %76 : vector<8x1xi32> to vector<8x1xi32>
    %80 = vector.broadcast %79 : vector<8x1xi32> to vector<8x8xi32>
    %81 = arith.select %78, %80, %75 : vector<8x8xi1>, vector<8x8xi32>
    %c63_i32 = arith.constant 63 : i32
    %82 = vector.broadcast %c63_i32 : i32 to vector<8x8xi32>
    %83 = arith.minsi %81, %82 : vector<8x8xi32>
    %c0_22 = arith.constant 0 : index
    %c0_23 = arith.constant 0 : index
    %c0_24 = arith.constant 0 : index
    %84 = vector.load %arg4[%c0_22, %c0_23, %c0_24] : memref<1x8x8xi32, #tpu.memory_space<vmem>>, vector<1x8x8xi32>
    %85 = vector.shape_cast %84 : vector<1x8x8xi32> to vector<8x8xi32>
    %86 = vector.shape_cast %83 : vector<8x8xi32> to vector<1x8x8xi32>
    tpu.vector_store %arg4[%c0_22, %c0_23, %c0_24], %86 {strides = array<i32>} : memref<1x8x8xi32, #tpu.memory_space<vmem>>, vector<1x8x8xi32>,
    return
  }
  func.func @transform_0(%arg0: i32, %arg1: i32) -> (i32, i32, i32) {
    %c0_i32 = arith.constant 0 : i32
    %c0_i32_0 = arith.constant 0 : i32
    return %arg0, %arg1, %c0_i32 : i32, i32, i32
  }
  func.func @transform_1(%arg0: i32, %arg1: i32) -> (i32, i32, i32) {
    %c0_i32 = arith.constant 0 : i32
    %c0_i32_0 = arith.constant 0 : i32
    %c0_i32_1 = arith.constant 0 : i32
    return %arg0, %c0_i32, %c0_i32_0 : i32, i32, i32
  }
  func.func @transform_2(%arg0: i32, %arg1: i32) -> (i32, i32, i32) {
    %c0_i32 = arith.constant 0 : i32
    %c0_i32_0 = arith.constant 0 : i32
    return %arg0, %arg1, %c0_i32 : i32, i32, i32
  }
}

module attributes {stable_mosaic.version = 11 : i64} {
  func.func @_sa_mlp_kernel(%arg0: i32, %arg1: i32, %arg2: memref<1x8x8x7xbf16, #tpu.memory_space<vmem>>, %arg3: memref<7x16xbf16, #tpu.memory_space<vmem>>, %arg4: memref<1x16xf32, #tpu.memory_space<vmem>>, %arg5: memref<16x128xbf16, #tpu.memory_space<vmem>>, %arg6: memref<1x128xf32, #tpu.memory_space<vmem>>, %arg7: memref<1x8x128xf32, #tpu.memory_space<vmem>>) attributes {dimension_semantics = [#tpu.dimension_semantics<parallel>, #tpu.dimension_semantics<parallel>], iteration_bounds = array<i64: 2, 2>, scalar_prefetch = 0 : i64, scratch_operands = 0 : i64, tpu.core_type = #tpu.core_type<tc>, window_params = [{transform_indices = @transform_0, window_bounds = array<i64: 1, 8, 8, 7>}, {pipeline_mode = #tpu.pipeline_mode<synchronous>, transform_indices = @transform_1, window_bounds = array<i64: 7, 16>}, {pipeline_mode = #tpu.pipeline_mode<synchronous>, transform_indices = @transform_2, window_bounds = array<i64: 1, 16>}, {pipeline_mode = #tpu.pipeline_mode<synchronous>, transform_indices = @transform_3, window_bounds = array<i64: 16, 128>}, {pipeline_mode = #tpu.pipeline_mode<synchronous>, transform_indices = @transform_4, window_bounds = array<i64: 1, 128>}, {transform_indices = @transform_5, window_bounds = array<i64: 1, 8, 128>}]} {
    %c0 = arith.constant 0 : index
    %c0_0 = arith.constant 0 : index
    %c0_1 = arith.constant 0 : index
    %c0_2 = arith.constant 0 : index
    %0 = vector.load %arg2[%c0, %c0_0, %c0_1, %c0_2] : memref<1x8x8x7xbf16, #tpu.memory_space<vmem>>, vector<1x8x8x7xbf16>
    %1 = vector.shape_cast %0 : vector<1x8x8x7xbf16> to vector<8x8x7xbf16>
    %c0_3 = arith.constant 0 : index
    %c0_4 = arith.constant 0 : index
    %2 = vector.load %arg3[%c0_3, %c0_4] : memref<7x16xbf16, #tpu.memory_space<vmem>>, vector<7x16xbf16>
    %c0_5 = arith.constant 0 : index
    %c0_6 = arith.constant 0 : index
    %3 = vector.load %arg4[%c0_5, %c0_6] : memref<1x16xf32, #tpu.memory_space<vmem>>, vector<1x16xf32>
    "tpu.trace_start"() <{level = 10 : i32, message = "nkc,cd->nkd"}> : () -> ()
    %cst = arith.constant dense<0.000000e+00> : vector<8x8x16xf32>
    %4 = tpu.matmul %1, %2, %cst {dimension_numbers = #tpu.dot_dimension_numbers<[2], [0], [0, 1], [1], [0, 0, 0, 1, 1, 1], [], []>} : vector<8x8x7xbf16>, vector<7x16xbf16>, vector<8x8x16xf32> -> vector<8x8x16xf32>
    "tpu.trace_stop"() : () -> ()
    %5 = vector.shape_cast %3 : vector<1x16xf32> to vector<1x1x16xf32>
    %6 = vector.broadcast %5 : vector<1x1x16xf32> to vector<8x8x16xf32>
    %7 = arith.addf %4, %6 : vector<8x8x16xf32>
    %cst_7 = arith.constant 0.000000e+00 : f32
    %8 = vector.broadcast %cst_7 : f32 to vector<8x8x16xf32>
    %9 = arith.maximumf %7, %8 : vector<8x8x16xf32>
    %10 = arith.truncf %9 : vector<8x8x16xf32> to vector<8x8x16xbf16>
    %c0_8 = arith.constant 0 : index
    %c0_9 = arith.constant 0 : index
    %11 = vector.load %arg5[%c0_8, %c0_9] : memref<16x128xbf16, #tpu.memory_space<vmem>>, vector<16x128xbf16>
    %c0_10 = arith.constant 0 : index
    %c0_11 = arith.constant 0 : index
    %12 = vector.load %arg6[%c0_10, %c0_11] : memref<1x128xf32, #tpu.memory_space<vmem>>, vector<1x128xf32>
    "tpu.trace_start"() <{level = 10 : i32, message = "nkc,cd->nkd"}> : () -> ()
    %cst_12 = arith.constant dense<0.000000e+00> : vector<8x8x128xf32>
    %13 = tpu.matmul %10, %11, %cst_12 {dimension_numbers = #tpu.dot_dimension_numbers<[2], [0], [0, 1], [1], [0, 0, 0, 1, 1, 1], [], []>} : vector<8x8x16xbf16>, vector<16x128xbf16>, vector<8x8x128xf32> -> vector<8x8x128xf32>
    "tpu.trace_stop"() : () -> ()
    %14 = vector.shape_cast %12 : vector<1x128xf32> to vector<1x1x128xf32>
    %15 = vector.broadcast %14 : vector<1x1x128xf32> to vector<8x8x128xf32>
    %16 = arith.addf %13, %15 : vector<8x8x128xf32>
    %cst_13 = arith.constant 0.000000e+00 : f32
    %17 = vector.broadcast %cst_13 : f32 to vector<8x8x128xf32>
    %18 = arith.maximumf %16, %17 : vector<8x8x128xf32>
    %cst_14 = arith.constant dense<0xFF800000> : vector<8x128xf32>
    %19 = vector.multi_reduction <maximumf>, %18, %cst_14 [1] : vector<8x8x128xf32> to vector<8x128xf32>
    %c0_15 = arith.constant 0 : index
    %c0_16 = arith.constant 0 : index
    %c0_17 = arith.constant 0 : index
    %20 = vector.load %arg7[%c0_15, %c0_16, %c0_17] : memref<1x8x128xf32, #tpu.memory_space<vmem>>, vector<1x8x128xf32>
    %21 = vector.shape_cast %20 : vector<1x8x128xf32> to vector<8x128xf32>
    %22 = vector.shape_cast %19 : vector<8x128xf32> to vector<1x8x128xf32>
    tpu.vector_store %arg7[%c0_15, %c0_16, %c0_17], %22 {strides = array<i32>} : memref<1x8x128xf32, #tpu.memory_space<vmem>>, vector<1x8x128xf32>,
    return
  }
  func.func @transform_0(%arg0: i32, %arg1: i32) -> (i32, i32, i32, i32) {
    %c0_i32 = arith.constant 0 : i32
    %c0_i32_0 = arith.constant 0 : i32
    %c0_i32_1 = arith.constant 0 : i32
    return %arg0, %arg1, %c0_i32, %c0_i32_0 : i32, i32, i32, i32
  }
  func.func @transform_1(%arg0: i32, %arg1: i32) -> (i32, i32) {
    %c0_i32 = arith.constant 0 : i32
    %c0_i32_0 = arith.constant 0 : i32
    %c0_i32_1 = arith.constant 0 : i32
    return %c0_i32, %c0_i32_0 : i32, i32
  }
  func.func @transform_2(%arg0: i32, %arg1: i32) -> (i32, i32) {
    %c0_i32 = arith.constant 0 : i32
    %c0_i32_0 = arith.constant 0 : i32
    %c0_i32_1 = arith.constant 0 : i32
    return %c0_i32, %c0_i32_0 : i32, i32
  }
  func.func @transform_3(%arg0: i32, %arg1: i32) -> (i32, i32) {
    %c0_i32 = arith.constant 0 : i32
    %c0_i32_0 = arith.constant 0 : i32
    %c0_i32_1 = arith.constant 0 : i32
    return %c0_i32, %c0_i32_0 : i32, i32
  }
  func.func @transform_4(%arg0: i32, %arg1: i32) -> (i32, i32) {
    %c0_i32 = arith.constant 0 : i32
    %c0_i32_0 = arith.constant 0 : i32
    %c0_i32_1 = arith.constant 0 : i32
    return %c0_i32, %c0_i32_0 : i32, i32
  }
  func.func @transform_5(%arg0: i32, %arg1: i32) -> (i32, i32, i32) {
    %c0_i32 = arith.constant 0 : i32
    %c0_i32_0 = arith.constant 0 : i32
    return %arg0, %arg1, %c0_i32 : i32, i32, i32
  }
}

</mosaic_0001>

<bundles_post_ra>
// kernel: pointnet_sa_forward.3
= control target key start
LH: loop header
LB: loop body
LE: loop exit
PB: predicated region body
PF: predicated region fallthrough
CT: control target
= control target key end

     0   :  { %s377_s6 = smov 0   ;;  %s443_s0 = inlined_call_operand.vmem [shape: f32[2,3,64], index: 0, kind: input, shape index: {}]   ;;  %s444_s1 = inlined_call_operand.vmem [shape: s32[2,1,16], index: 1, kind: output, shape index: {}]  }
   0x1 LB: > { %s283_s7 = sadd.s32 4294967295, %s352_s6   ;;  %p287_p0 = scmp.ge.s32.totalorder %s352_s6, 1  ;;  %s352_s6 = sphi %s377_s6, %s11_s6  }
   0x2   : > { %p86_p1 = scmp.lt.s32.totalorder %s352_s6, 3 }
   0x4   : > { %p87_p2 = pnand %p287_p0, %p86_p1 }
   0x5   : > { %p103_p3 = scmp.lt.s32.totalorder (!%p87_p2), %s283_s7, 1  ;;  %s400_s15 = smov (!%p87_p2), 0  }
   0x6   : > { %90 = sbr.rel (%p87_p2) target bundleno = 792 (0x318), region = 24  ;;  %s404_s16 = smov (!%p87_p2), 1  }
   0xb   : > { %v111_v0 = vlaneseq  ;;  %vm113_vm0 = vcmask 516096   ;;  %v366_v1 = vmov 1e+10   ;;  %s447_s7 = smov (!%p103_p3, %s283_s7), 1  ;;  %v402_v4 = vmov 0  }
   0xc   : > { %114 = vst.msk [vmem:[#allocation2] sm:$0x1] %vm113_vm0, %v366_v1  ;;  %s288_s8 = sshll.u32 %s447_s7, 2  ;;  %s109_s11 = scalar_lea.vmem %s444_s1, %s447_s7 }
   0xd   : > { %v388_v2 = vand.u32 127, %v111_v0  ;;  %s106_s14 = scalar_lea.vmem %s443_s0, %s288_s8 }
   0xe   : > { %v398_v3 = vld [vmem:[%s106_s14] sm:$0x7] }
   0xf LB: >> { %v123_v5 = vstv %s356_s15  ;;  %s364_s16 = sphi %s404_s16, %s120_s16   ;;  %v360_v4 = vphi %v402_v4, %v445_v4   ;;  %s356_s15 = sphi %s400_s15, %s300_s15  }
  0x10   : >> { %vm124_vm1 = vcmp.eq.s32.totalorder %v388_v2, %v123_v5 }
  0x11   : >> { %v125_v6 = vsel %vm124_vm1, %v398_v3, 0.0 }
  0x12   : >> { %v126_v7 = vsel %vm113_vm0, %v125_v6, 0.0  ;;  %v149_v8 = vrot.slane %v125_v6, 2  ;;  %v137_v9 = vrot.slane %v125_v6, 1 }
  0x13   : >> { %127 = vadd.xlane.f32.xlu0 %v126_v7  ;;  %v178_v45 = vld [vmem:[#allocation2] sm:$0x1] }
  0x14   : >> { %v151_v10 = vsel %vm113_vm0, %v149_v8, 0.0  ;;  %v139_v11 = vsel %vm113_vm0, %v137_v9, 0.0 }
  0x15   : >> { %152 = vadd.xlane.f32.xlu1 %v151_v10 }
  0x17   : >> { %140 = vadd.xlane.f32.xlu0 %v139_v11 }
  0x9c   : >> { %v128_v12 = vpop.xlane.xlu0 %127 }
  0x9d   : >> { %v129_v13 = vrot.slane %v128_v12, 4 }
  0x9e   : >> { %v153_v14 = vpop.xlane.xlu1 %152 }
  0x9f   : >> { %v130_v15 = vadd.f32 %v129_v13, %v128_v12  ;;  %v154_v16 = vrot.slane %v153_v14, 4 }
  0xa0   : >> { %v141_v17 = vpop.xlane.xlu0 %140 }
  0xa1   : >> { %v131_v18 = vrot.slane %v130_v15, 2  ;;  %v155_v19 = vadd.f32 %v154_v16, %v153_v14  ;;  %v142_v20 = vrot.slane %v141_v17, 4 }
  0xa3   : >> { %v156_v21 = vrot.slane %v155_v19, 2  ;;  %v143_v22 = vadd.f32 %v142_v20, %v141_v17  ;;  %v132_v23 = vadd.f32 %v131_v18, %v130_v15  ;;  %v219_v15 = vstv %s364_s16  ;;  %s120_s16 = sadd.s32 1, %s364_s16  }
  0xa4   : >> { %vm220_vm7 = vcmp.eq.s32.totalorder %v388_v2, %v219_v15  ;;  %p117_p4 = scmp.ge.s32.totalorder %s120_s16, 16  }
  0xa5   : >> { %v144_v24 = vrot.slane %v143_v22, 2  ;;  %v133_v25 = vrot.slane %v132_v23, 1  ;;  %v157_v26 = vadd.f32 %v156_v21, %v155_v19  ;;  %vm223_vm8 = vcmask (%p117_p4), 122880  }
  0xa7   : >> { %v134_v27 = vadd.f32 %v133_v25, %v132_v23  ;;  %v145_v28 = vadd.f32 %v144_v24, %v143_v22  ;;  %v158_v29 = vrot.slane %v157_v26, 1 }
  0xa9   : >> { %291 = vpush %v134_v27  ;;  %v146_v30 = vrot.slane %v145_v28, 1  ;;  %v159_v32 = vadd.f32 %v158_v29, %v157_v26 }
  0xab   : >> { %v147_v31 = vadd.f32 %v146_v30, %v145_v28 }
  0xad   : >> { %293 = vpush %v147_v31 }
  0xae   : >> { %295 = vpush %v159_v32 }
  0xda   : >> { %s292_s17 = spop %291 }
  0xdb   : >> { %v161_v33 = vstv %s292_s17 }
  0xdc   : >> { %v162_v35 = vsub.f32 %v398_v3, %v161_v33 }
  0xde   : >> { %s294_s18 = spop %293  ;;  %v163_v41 = vmul.f32 %v162_v35, %v162_v35 }
  0xdf   : >> { %v164_v34 = vstv %s294_s18  ;;  %s296_s19 = spop %295 }
  0xe0   : >> { %v165_v36 = vsub.f32 %v398_v3, %v164_v34  ;;  %v171_v37 = vstv %s296_s19 }
  0xe1   : >> { %v172_v38 = vsub.f32 %v398_v3, %v171_v37 }
  0xe2   : >> { %v166_v39 = vmul.f32 %v165_v36, %v165_v36 }
  0xe3   : >> { %v173_v40 = vmul.f32 %v172_v38, %v172_v38 }
  0xe4   : >> { %v168_v42 = vrot.slane %v166_v39, 1 }
  0xe5   : >> { %v175_v44 = vrot.slane %v173_v40, 2 }
  0xe6   : >> { %v170_v43 = vadd.f32 %v168_v42, %v163_v41 }
  0xe8   : >> { %v177_v46 = vadd.f32 %v175_v44, %v170_v43 }
  0xea   : >> { %v179_v47 = vmin.f32 %v178_v45, %v177_v46 }
  0xec   : >> { %v181_v48 = vsel %vm113_vm0, %v179_v47, -inf  ;;  %180 = vst.msk [vmem:[#allocation2] sm:$0x1] %vm113_vm0, %v179_v47 }
  0xed   : >> { %182 = vmax.xlane.f32.xlu1 %v181_v48 }
 0x176   : >> { %v183_v49 = vpop.xlane.xlu1 %182 }
 0x177   : >> { %v184_v50 = vrot.slane %v183_v49, 4 }
 0x179   : >> { %v185_v51 = vmax.f32 %v183_v49, %v184_v50 }
 0x17b   : >> { %v186_v52 = vrot.slane %v185_v51, 2 }
 0x17d   : >> { %v187_v53 = vmax.f32 %v185_v51, %v186_v52 }
 0x17f   : >> { %v188_v54 = vrot.slane %v187_v53, 1 }
 0x181   : >> { %v189_v55 = vmax.f32 %v187_v53, %v188_v54 }
 0x183   : >> { %297 = vpush %v189_v55 }
 0x1b4   : >> { %s298_s20 = spop %297 }
 0x1b5   : >> { %v191_v56 = vstv %s298_s20 }
 0x1b6   : >> { %vm192_vm2 = vcmp.eq.f32.partialorder %v179_v47, %v191_v56 }
 0x1b7   : >> { %v193_v57 = vsel %vm192_vm2, %v388_v2, 64 }
 0x1b8   : >> { %v194_v58 = vsel %vm113_vm0, %v193_v57, 2147483647 }
 0x1b9   : >> { %v196_v59 = vshra.s32 %v194_v58, 16  ;;  %v195_v61 = vand.u32 65535, %v194_v58 }
 0x1bb   : >> { %v198_v60 = vcvt.s32.f32 %v196_v59  ;;  %v197_v63 = vcvt.s32.f32 %v195_v61 }
 0x1bd   : >> { %199 = vmin.xlane.f32.xlu0 %v198_v60 }
 0x246   : >> { %v200_v62 = vpop.xlane.xlu0 %199 }
 0x247   : >> { %vm201_vm3 = vcmp.eq.f32.partialorder %v198_v60, %v200_v62  ;;  %v206_v1 = vcvt.f32.s32 %v200_v62 }
 0x248   : >> { %v202_v0 = vsel %vm201_vm3, %v197_v63, inf }
 0x249   : >> { %203 = vmin.xlane.f32.xlu1 %v202_v0  ;;  %v207_v6 = vshll.u32 %v206_v1, 16 }
 0x2d2   : >> { %v204_v5 = vpop.xlane.xlu1 %203 }
 0x2d3   : >> { %v205_v7 = vcvt.f32.s32 %v204_v5 }
 0x2d5   : >> { %v208_v8 = vadd.s32 %v207_v6, %v205_v7 }
 0x2d7   : >> { %v209_v9 = vrot.slane %v208_v8, 4 }
 0x2d9   : >> { %vm210_vm4 = vcmp.lt.s32.totalorder %v208_v8, %v209_v9 }
 0x2da   : >> { %v211_v10 = vsel %vm210_vm4, %v208_v8, %v209_v9 }
 0x2db   : >> { %v212_v11 = vrot.slane %v211_v10, 2 }
 0x2dd   : >> { %vm213_vm5 = vcmp.lt.s32.totalorder %v211_v10, %v212_v11 }
 0x2de   : >> { %v214_v12 = vsel %vm213_vm5, %v211_v10, %v212_v11 }
 0x2df   : >> { %v215_v13 = vrot.slane %v214_v12, 1 }
 0x2e1   : >> { %vm216_vm6 = vcmp.lt.s32.totalorder %v214_v12, %v215_v13 }
 0x2e2   : >> { %v217_v14 = vsel %vm216_vm6, %v214_v12, %v215_v13 }
 0x2e3   : >> { %299 = vpush %v217_v14 }
 0x313   : > { %119 = sbr.rel (!%p117_p4) target bundleno = 15 (0xf), region = 61 }
 0x314   : >> { %s300_s15 = spop %299  }
 0x315   : >> { %v221_v16 = vstv %s300_s15 }
 0x316   : >> { %v222_v17 = vsel %vm220_vm7, %v221_v16, %v360_v4  }
 0x317   : >> { %v445_v4 = vmov %v222_v17  ;;  %224 = vst.msk [vmem:[%s109_s11] sm:$0x1] (%p117_p4), %vm223_vm8, %v222_v17 }
 0x318 PF: > { %s11_s6 = sadd.s32 1, %s352_s6  }
 0x319   : > { %p8_p5 = scmp.ge.s32.totalorder %s11_s6, 4  }
 0x31b   :  { %10 = sbr.rel (!%p8_p5) target bundleno = 1 (0x1), region = 72 }

// kernel: pointnet_sa_forward.4
= control target key start
LH: loop header
LB: loop body
LE: loop exit
PB: predicated region body
PF: predicated region fallthrough
CT: control target
= control target key end

     0   :  { %s606_s9 = smov 0   ;;  %s608_s10 = smov 0   ;;  %s675_s0 = inlined_call_operand.vmem [shape: f32[2,16,3], index: 0, kind: input, shape index: {}]   ;;  %s676_s1 = inlined_call_operand.vmem [shape: f32[2,3,64], index: 1, kind: input, shape index: {}]   ;;  %s677_s2 = inlined_call_operand.vmem [shape: s32[2,16,8], index: 2, kind: output, shape index: {}]  }
   0x1   :  { %s610_s11 = smov 0   ;;  %s612_s12 = smov 0  }
   0x2   :  { %s614_s13 = smov 0  }
   0x3 LB: > { %s21_s14 = sadd.s32 1, %s578_s11  ;;  %s24_s15 = sadd.s32 1, %s582_s12  ;;  %s586_s13 = sphi %s614_s13, %s12_s13   ;;  %s582_s12 = sphi %s612_s12, %s681_s12   ;;  %s578_s11 = sphi %s610_s11, %s680_s11   ;;  %s574_s10 = sphi %s608_s10, %s679_s10   ;;  %s570_s9 = sphi %s606_s9, %s678_s9  }
   0x4   : > { %p22_p0 = scmp.ge.s32.totalorder %s21_s14, 2  ;;  %p492_p1 = scmp.ge.s32.totalorder %s586_s13, 1 }
   0x5   : > { %p140_p2 = scmp.lt.s32.totalorder %s586_s13, 5 }
   0x6   : > { %s683_s14 = smov (%p22_p0, %s21_s14), 0  ;;  %s685_s15 = smov (!%p22_p0, %s24_s15), %s582_s12 }
   0x7   : > { %p141_p3 = pnand %p492_p1, %p140_p2  ;;  %p26_p4 = scmp.ge.s32.totalorder %s685_s15, 2 }
   0x8   : > { %p172_p5 = scmp.lt.s32.totalorder (!%p141_p3), %s574_s10, 1  ;;  %p174_p6 = scmp.lt.s32.totalorder (!%p141_p3), %s570_s9, 1 }
   0x9   : > { %s687_s15 = smov (%p26_p4, %s685_s15), 0  ;;  %144 = sbr.rel (%p141_p3) target bundleno = 2598 (0xa26), region = 28 }
   0xe   : > { %v588_v0 = vmov 0   ;;  %v589_v1 = vmov 2   ;;  %s689_s10 = smov (!%p172_p5, %s574_s10), 1  ;;  %s691_s9 = smov (!%p174_p6, %s570_s9), 1  ;;  %v590_v3 = vmov 1   ;;  %v199_v4 = vlaneseq }
   0xf   : > { %543 = vset.pattern.permute.xlu0 %v588_v0  ;;  %545 = vset.pattern.permute.xlu1 %v589_v1  ;;  %s493_s16 = sshll.u32 %s689_s10, 1  ;;  %s495_s22 = sshll.u32 %s689_s10, 2  ;;  %vm232_vm0 = vcmask 523264   ;;  %vm367_vm7 = vcmask 7168   ;;  %vm369_vm8 = vcmask 15360   ;;  %vm371_vm11 = vcmask 23552  }
  0x10   : > { %s636_s17 = sadd.s32 %s493_s16, %s691_s9  ;;  %v200_v5 = vshrl.u32 %v199_v4, 7  ;;  %s183_s25 = scalar_lea.vmem %s676_s1, %s495_s22  ;;  %v229_v23 = vand.u32 127, %v199_v4  ;;  %vm373_vm14 = vcmask 31744  }
  0x11   : > { %s494_s18 = sshll.u32 %s636_s17, 3  ;;  %v193_v8 = vld [vmem:[%s183_s25] sm:$0x7] }
  0x12   : > { %s179_s21 = scalar_lea.vmem %s675_s0, %s494_s18  ;;  %v201_v6 = vsub.s32 0, %v200_v5  ;;  %v223_v7 = vsub.s32 2, %v200_v5  ;;  %v212_v9 = vsub.s32 1, %v200_v5  ;;  %s191_s28 = scalar_lea.vmem %s677_s2, %s494_s18 }
  0x13   : > { %v192_v2 = vld [vmem:[%s179_s21] sm:$0xff] }
  0x14   : > { %196 = vperm.xlu0 %543, %v192_v2   ;;  %218 = vperm.xlu1 %545, %v192_v2   ;;  %v202_v10 = vrot.slane %v193_v8, %v201_v6  ;;  %v224_v12 = vrot.slane %v193_v8, %v223_v7  ;;  %v213_v14 = vrot.slane %v193_v8, %v212_v9 }
  0x18   : > { %544 = vset.pattern.permute.xlu0 %v590_v3  ;;  %546 = vset.pattern.permute.xlu1 %v588_v0 }
  0x19   : > { %207 = vperm.xlu0 %544, %v192_v2  }
  0x1d   : > { %547 = vset.pattern.permute.xlu0 %v588_v0 }
  0x8f   : > { %v197_v11 = vpop.permute.xlu0 %196  ;;  %v219_v13 = vpop.permute.xlu1 %218 }
  0x90   : > { %v203_v15 = vsub.f32 %v197_v11, %v202_v10  ;;  %v225_v16 = vsub.f32 %v219_v13, %v224_v12 }
  0x92   : > { %v204_v19 = vmul.f32 %v203_v15, %v203_v15  ;;  %v226_v21 = vmul.f32 %v225_v16, %v225_v16 }
  0x94   : > { %v208_v17 = vpop.permute.xlu0 %207 }
  0x95   : > { %v214_v18 = vsub.f32 %v208_v17, %v213_v14 }
  0x97   : > { %v215_v20 = vmul.f32 %v214_v18, %v214_v18 }
  0x99   : > { %v216_v22 = vadd.f32 %v215_v20, %v204_v19 }
  0x9b   : > { %v227_v24 = vadd.f32 %v226_v21, %v216_v22 }
  0x9d   : > { %vm230_vm1 = vcmp.lt.f32.partialorder %v227_v24, 0.64 }
  0x9e   : > { %v231_v25 = vsel %vm230_vm1, %v229_v23, 64 }
  0x9f   : > { %v233_v26 = vsel %vm232_vm0, %v231_v25, 2147483647 }
  0xa0   : > { %v235_v27 = vshra.s32 %v233_v26, 16  ;;  %v234_v29 = vand.u32 65535, %v233_v26 }
  0xa2   : > { %v237_v28 = vcvt.s32.f32 %v235_v27  ;;  %v236_v31 = vcvt.s32.f32 %v234_v29 }
  0xa4   : > { %238 = vmin.xlane.f32.xlu1 %v237_v28 }
 0x12d   : > { %v239_v30 = vpop.xlane.xlu1 %238 }
 0x12e   : > { %vm240_vm2 = vcmp.eq.f32.partialorder %v237_v28, %v239_v30  ;;  %v245_v33 = vcvt.f32.s32 %v239_v30 }
 0x12f   : > { %v241_v32 = vsel %vm240_vm2, %v236_v31, inf  ;;  %vm375_vm2 = vcmask 39936  }
 0x130   : > { %242 = vmin.xlane.f32.xlu0 %v241_v32  ;;  %v246_v35 = vshll.u32 %v245_v33, 16 }
 0x1b9   : > { %v243_v34 = vpop.xlane.xlu0 %242 }
 0x1ba   : > { %v244_v36 = vcvt.f32.s32 %v243_v34 }
 0x1bc   : > { %v247_v37 = vadd.s32 %v246_v35, %v244_v36 }
 0x1be   : > { %vm248_vm3 = vcmp.eq.s32.totalorder %v231_v25, %v247_v37 }
 0x1bf   : > { %v249_v38 = vsel %vm248_vm3, 64, %v231_v25 }
 0x1c0   : > { %v250_v39 = vsel %vm232_vm0, %v249_v38, 2147483647 }
 0x1c1   : > { %v252_v40 = vshra.s32 %v250_v39, 16  ;;  %v251_v42 = vand.u32 65535, %v250_v39 }
 0x1c3   : > { %v254_v41 = vcvt.s32.f32 %v252_v40  ;;  %v253_v44 = vcvt.s32.f32 %v251_v42 }
 0x1c5   : > { %255 = vmin.xlane.f32.xlu1 %v254_v41 }
 0x24e   : > { %v256_v43 = vpop.xlane.xlu1 %255 }
 0x24f   : > { %vm257_vm4 = vcmp.eq.f32.partialorder %v254_v41, %v256_v43  ;;  %v262_v46 = vcvt.f32.s32 %v256_v43 }
 0x250   : > { %v258_v45 = vsel %vm257_vm4, %v253_v44, inf }
 0x251   : > { %259 = vmin.xlane.f32.xlu0 %v258_v45  ;;  %v263_v48 = vshll.u32 %v262_v46, 16 }
 0x2da   : > { %v260_v47 = vpop.xlane.xlu0 %259 }
 0x2db   : > { %v261_v49 = vcvt.f32.s32 %v260_v47 }
 0x2dd   : > { %v264_v50 = vadd.s32 %v263_v48, %v261_v49 }
 0x2df   : > { %vm265_vm5 = vcmp.eq.s32.totalorder %v249_v38, %v264_v50  ;;  %v368_v0 = vsel %vm367_vm7, %v247_v37, %v264_v50 }
 0x2e0   : > { %v266_v51 = vsel %vm265_vm5, 64, %v249_v38  ;;  %vm377_vm5 = vcmask 48128  }
 0x2e1   : > { %v267_v52 = vsel %vm232_vm0, %v266_v51, 2147483647 }
 0x2e2   : > { %v269_v53 = vshra.s32 %v267_v52, 16  ;;  %v268_v55 = vand.u32 65535, %v267_v52 }
 0x2e4   : > { %v271_v54 = vcvt.s32.f32 %v269_v53  ;;  %v270_v57 = vcvt.s32.f32 %v268_v55 }
 0x2e6   : > { %272 = vmin.xlane.f32.xlu1 %v271_v54 }
 0x36f   : > { %v273_v56 = vpop.xlane.xlu1 %272 }
 0x370   : > { %vm274_vm6 = vcmp.eq.f32.partialorder %v271_v54, %v273_v56  ;;  %v279_v59 = vcvt.f32.s32 %v273_v56 }
 0x371   : > { %v275_v58 = vsel %vm274_vm6, %v270_v57, inf }
 0x372   : > { %276 = vmin.xlane.f32.xlu0 %v275_v58  ;;  %v280_v61 = vshll.u32 %v279_v59, 16 }
 0x3fb   : > { %v277_v60 = vpop.xlane.xlu0 %276 }
 0x3fc   : > { %v278_v62 = vcvt.f32.s32 %v277_v60 }
 0x3fe   : > { %v281_v63 = vadd.s32 %v280_v61, %v278_v62 }
 0x400   : > { %vm282_vm9 = vcmp.eq.s32.totalorder %v266_v51, %v281_v63  ;;  %v370_v1 = vsel %vm369_vm8, %v368_v0, %v281_v63  ;;  %vm379_vm8 = vcmask 56320  }
 0x401   : > { %v283_v2 = vsel %vm282_vm9, 64, %v266_v51  ;;  %vm388_vm9 = vcmask 64512  }
 0x402   : > { %v284_v3 = vsel %vm232_vm0, %v283_v2, 2147483647 }
 0x403   : > { %v286_v4 = vshra.s32 %v284_v3, 16  ;;  %v285_v6 = vand.u32 65535, %v284_v3 }
 0x405   : > { %v288_v5 = vcvt.s32.f32 %v286_v4  ;;  %v287_v8 = vcvt.s32.f32 %v285_v6 }
 0x407   : > { %289 = vmin.xlane.f32.xlu1 %v288_v5 }
 0x490   : > { %v290_v7 = vpop.xlane.xlu1 %289 }
 0x491   : > { %vm291_vm10 = vcmp.eq.f32.partialorder %v288_v5, %v290_v7  ;;  %v296_v10 = vcvt.f32.s32 %v290_v7 }
 0x492   : > { %v292_v9 = vsel %vm291_vm10, %v287_v8, inf }
 0x493   : > { %293 = vmin.xlane.f32.xlu0 %v292_v9  ;;  %v297_v12 = vshll.u32 %v296_v10, 16 }
 0x51c   : > { %v294_v11 = vpop.xlane.xlu0 %293 }
 0x51d   : > { %v295_v13 = vcvt.f32.s32 %v294_v11 }
 0x51f   : > { %v298_v14 = vadd.s32 %v297_v12, %v295_v13 }
 0x521   : > { %vm299_vm12 = vcmp.eq.s32.totalorder %v283_v2, %v298_v14  ;;  %v372_v15 = vsel %vm371_vm11, %v370_v1, %v298_v14 }
 0x522   : > { %v300_v16 = vsel %vm299_vm12, 64, %v283_v2 }
 0x523   : > { %v301_v17 = vsel %vm232_vm0, %v300_v16, 2147483647 }
 0x524   : > { %v303_v18 = vshra.s32 %v301_v17, 16  ;;  %v302_v20 = vand.u32 65535, %v301_v17 }
 0x526   : > { %v305_v19 = vcvt.s32.f32 %v303_v18  ;;  %v304_v22 = vcvt.s32.f32 %v302_v20 }
 0x528   : > { %306 = vmin.xlane.f32.xlu1 %v305_v19 }
 0x5b1   : > { %v307_v21 = vpop.xlane.xlu1 %306 }
 0x5b2   : > { %vm308_vm13 = vcmp.eq.f32.partialorder %v305_v19, %v307_v21  ;;  %v313_v24 = vcvt.f32.s32 %v307_v21 }
 0x5b3   : > { %v309_v23 = vsel %vm308_vm13, %v304_v22, inf }
 0x5b4   : > { %310 = vmin.xlane.f32.xlu0 %v309_v23  ;;  %v314_v26 = vshll.u32 %v313_v24, 16 }
 0x63d   : > { %v311_v25 = vpop.xlane.xlu0 %310 }
 0x63e   : > { %v312_v27 = vcvt.f32.s32 %v311_v25 }
 0x640   : > { %v315_v28 = vadd.s32 %v314_v26, %v312_v27 }
 0x642   : > { %vm316_vm15 = vcmp.eq.s32.totalorder %v300_v16, %v315_v28  ;;  %v374_v29 = vsel %vm373_vm14, %v372_v15, %v315_v28 }
 0x643   : > { %v317_v30 = vsel %vm316_vm15, 64, %v300_v16 }
 0x644   : > { %v318_v31 = vsel %vm232_vm0, %v317_v30, 2147483647 }
 0x645   : > { %v320_v32 = vshra.s32 %v318_v31, 16  ;;  %v319_v34 = vand.u32 65535, %v318_v31 }
 0x647   : > { %v322_v33 = vcvt.s32.f32 %v320_v32  ;;  %v321_v36 = vcvt.s32.f32 %v319_v34 }
 0x649   : > { %323 = vmin.xlane.f32.xlu1 %v322_v33 }
 0x6d2   : > { %v324_v35 = vpop.xlane.xlu1 %323 }
 0x6d3   : > { %vm325_vm1 = vcmp.eq.f32.partialorder %v322_v33, %v324_v35  ;;  %v330_v38 = vcvt.f32.s32 %v324_v35 }
 0x6d4   : > { %v326_v37 = vsel %vm325_vm1, %v321_v36, inf }
 0x6d5   : > { %327 = vmin.xlane.f32.xlu0 %v326_v37  ;;  %v331_v40 = vshll.u32 %v330_v38, 16 }
 0x75e   : > { %v328_v39 = vpop.xlane.xlu0 %327 }
 0x75f   : > { %v329_v41 = vcvt.f32.s32 %v328_v39 }
 0x761   : > { %v332_v42 = vadd.s32 %v331_v40, %v329_v41 }
 0x763   : > { %vm333_vm3 = vcmp.eq.s32.totalorder %v317_v30, %v332_v42  ;;  %v376_v43 = vsel %vm375_vm2, %v374_v29, %v332_v42 }
 0x764   : > { %v334_v44 = vsel %vm333_vm3, 64, %v317_v30 }
 0x765   : > { %v335_v45 = vsel %vm232_vm0, %v334_v44, 2147483647 }
 0x766   : > { %v337_v46 = vshra.s32 %v335_v45, 16  ;;  %v336_v48 = vand.u32 65535, %v335_v45 }
 0x768   : > { %v339_v47 = vcvt.s32.f32 %v337_v46  ;;  %v338_v50 = vcvt.s32.f32 %v336_v48 }
 0x76a   : > { %340 = vmin.xlane.f32.xlu1 %v339_v47 }
 0x7f3   : > { %v341_v49 = vpop.xlane.xlu1 %340 }
 0x7f4   : > { %vm342_vm4 = vcmp.eq.f32.partialorder %v339_v47, %v341_v49  ;;  %v347_v52 = vcvt.f32.s32 %v341_v49 }
 0x7f5   : > { %v343_v51 = vsel %vm342_vm4, %v338_v50, inf }
 0x7f6   : > { %344 = vmin.xlane.f32.xlu0 %v343_v51  ;;  %v348_v54 = vshll.u32 %v347_v52, 16 }
 0x87f   : > { %v345_v53 = vpop.xlane.xlu0 %344 }
 0x880   : > { %v346_v55 = vcvt.f32.s32 %v345_v53 }
 0x882   : > { %v349_v56 = vadd.s32 %v348_v54, %v346_v55 }
 0x884   : > { %vm350_vm6 = vcmp.eq.s32.totalorder %v334_v44, %v349_v56  ;;  %v378_v57 = vsel %vm377_vm5, %v376_v43, %v349_v56 }
 0x885   : > { %v351_v58 = vsel %vm350_vm6, 64, %v334_v44 }
 0x886   : > { %v352_v59 = vsel %vm232_vm0, %v351_v58, 2147483647 }
 0x887   : > { %v354_v60 = vshra.s32 %v352_v59, 16  ;;  %v353_v62 = vand.u32 65535, %v352_v59 }
 0x889   : > { %v356_v61 = vcvt.s32.f32 %v354_v60  ;;  %v355_v0 = vcvt.s32.f32 %v353_v62 }
 0x88b   : > { %357 = vmin.xlane.f32.xlu1 %v356_v61 }
 0x914   : > { %v358_v63 = vpop.xlane.xlu1 %357 }
 0x915   : > { %vm359_vm7 = vcmp.eq.f32.partialorder %v356_v61, %v358_v63  ;;  %v364_v2 = vcvt.f32.s32 %v358_v63 }
 0x916   : > { %v360_v1 = vsel %vm359_vm7, %v355_v0, inf }
 0x917   : > { %361 = vmin.xlane.f32.xlu0 %v360_v1  ;;  %v365_v4 = vshll.u32 %v364_v2, 16 }
 0x9a0   : > { %v362_v3 = vpop.xlane.xlu0 %361 }
 0x9a1   : > { %v363_v5 = vcvt.f32.s32 %v362_v3 }
 0x9a3   : > { %v366_v6 = vadd.s32 %v365_v4, %v363_v5 }
 0x9a5   : > { %v380_v7 = vsel %vm379_vm8, %v378_v57, %v366_v6 }
 0x9a6   : > { %383 = vperm.xlu1 %546, %v380_v7   ;;  %vm381_vm0 = vcmp.ge.s32.totalorder %v380_v7, 64 }
 0xa21   : > { %v384_v8 = vpop.permute.xlu1 %383 }
 0xa22   : > { %v385_v9 = vsel %vm381_vm0, %v384_v8, %v380_v7 }
 0xa23   : > { %vm386_vm10 = vcmp.lt.s32.totalorder %v385_v9, 63 }
 0xa24   : > { %v387_v10 = vsel %vm386_vm10, %v385_v9, 63 }
 0xa25   : > { %389 = vst.msk [vmem:[%s191_s28] sm:$0xff] %vm388_vm9, %v387_v10 }
 0xa26 PF: > { %s12_s13 = sadd.s32 1, %s586_s13   ;;  %s678_s9 = smov %s578_s11 }
 0xa27   : > { %p9_p7 = scmp.ge.s32.totalorder %s12_s13, 6   ;;  %s679_s10 = smov %s582_s12 }
 0xa28   : > { %s680_s11 = smov %s683_s14  ;;  %s681_s12 = smov %s687_s15 }
 0xa29   :  { %11 = sbr.rel (!%p9_p7) target bundleno = 3 (0x3), region = 61 }

// kernel: pointnet_sa_forward.5
= control target key start
LH: loop header
LB: loop body
LE: loop exit
PB: predicated region body
PF: predicated region fallthrough
CT: control target
= control target key end

     0   :  { %s860_s18 = smov 0   ;;  %s862_s19 = smov 0   ;;  %s936_s0 = inlined_call_operand.vmem [shape: bf16[2,16,8,7], index: 0, kind: input, shape index: {}]   ;;  %s937_s1 = inlined_call_operand.vmem [shape: bf16[7,16], index: 1, kind: input, shape index: {}]   ;;  %s938_s2 = inlined_call_operand.vmem [shape: f32[1,16], index: 2, kind: input, shape index: {}]   ;;  %s939_s3 = inlined_call_operand.vmem [shape: bf16[16,128], index: 3, kind: input, shape index: {}]   ;;  %s940_s4 = inlined_call_operand.vmem [shape: f32[1,128], index: 4, kind: input, shape index: {}]   ;;  %s941_s5 = inlined_call_operand.vmem [shape: f32[2,16,128], index: 5, kind: output, shape index: {}]  }
   0x1   :  { %s864_s20 = smov 0   ;;  %s866_s21 = smov 0  }
   0x2   :  { %s868_s22 = smov 0  }
   0x3 LB: > { %s24_s23 = sadd.s32 1, %s819_s20  ;;  %s27_s24 = sadd.s32 1, %s823_s21  ;;  %s827_s22 = sphi %s868_s22, %s15_s22   ;;  %s823_s21 = sphi %s866_s21, %s945_s21   ;;  %s819_s20 = sphi %s864_s20, %s944_s20   ;;  %s815_s19 = sphi %s862_s19, %s943_s19   ;;  %s811_s18 = sphi %s860_s18, %s942_s18  }
   0x4   : > { %p25_p0 = scmp.ge.s32.totalorder %s24_s23, 2  ;;  %p682_p1 = scmp.ge.s32.totalorder %s827_s22, 1 }
   0x5   : > { %p208_p2 = scmp.lt.s32.totalorder %s827_s22, 5 }
   0x6   : > { %s947_s23 = smov (%p25_p0, %s24_s23), 0  ;;  %s949_s24 = smov (!%p25_p0, %s27_s24), %s823_s21 }
   0x7   : > { %p209_p3 = pnand %p682_p1, %p208_p2  ;;  %p29_p4 = scmp.ge.s32.totalorder %s949_s24, 2 }
   0x8   : > { %s683_s27 = sshll.u32 (!%p209_p3), %s811_s18, 3  ;;  %p244_p5 = scmp.lt.s32.totalorder (!%p209_p3), %s815_s19, 1 }
   0x9   : > { %s951_s24 = smov (%p29_p4, %s949_s24), 0  ;;  %212 = sbr.rel (%p209_p3) target bundleno = 456 (0x1c8), region = 40 }
   0xa   : > { %p246_p6 = scmp.lt.s32.totalorder (!%p209_p3), %s683_s27, 15  ;;  %p255_p7 = scmp.lt.s32.totalorder (!%p209_p3), %s811_s18, 1 }
   0xe   : > { %v270_v0 = vld [vmem:[%s937_s1] sm:$0xf]  ;;  %vm311_vm0 = vcmask 1042432   ;;  %vm312_vm1 = vcmask 1043456   ;;  %v829_v1 = vmov 65535   ;;  %s953_s19 = smov (!%p244_p5, %s815_s19), 1 }
   0xf   : > { %v313_v2 = vsel %vm311_vm0, 4294967295, %v829_v1  ;;  %s955_s27 = smov (!%p246_p6, %s683_s27), 15  ;;  %s684_s28 = sshll.u32 %s953_s19, 4  ;;  %vm298_vm2 = vcmask 56320   ;;  %v788_v9 = vld [vmem:[%s939_s3] sm:$0xff]   ;;  %vm434_vm3 = vcmask 130048  }
  0x10   : > { %v314_v3 = vsel %vm312_vm1, %v313_v2, 0  ;;  %s249_s29 = sadd.s32 %s684_s28, %s955_s27  ;;  %733 = vmatprep.subr.bf16.mxu1 %v788_v9  ;;  %v688_v12 = vld [vmem:[%s938_s2] ss:$0 sm:$0xff]  ;;  %vm576_vm4 = vcmask 1041409   ;;  %vm578_vm5 = vcmask 1042434   ;;  %s957_s18 = smov (!%p255_p7, %s811_s18), 1 }
  0x11   : > { %v316_v4 = vand.u32 %v314_v3, %v270_v0  ;;  %s685_s30 = sshll.u32 %s249_s29, 2  ;;  %734 = vmatpush3.bf16.msra.mxu1 %v788_v9  ;;  %v697_v39 = vld [vmem:[%s940_s4] ss:$0 sm:$0xff]  ;;  %s686_s15 = sshll.u32 %s953_s19, 1  ;;  %vm580_vm6 = vcmask 1043459   ;;  %vm582_vm7 = vcmask 1044484  }
  0x12   : > { %s251_s8 = scalar_lea.vmem %s936_s0, %s685_s30  ;;  %s258_s16 = sadd.s32 %s686_s15, %s957_s18  ;;  %vm584_vm8 = vcmask 1045509   ;;  %vm586_vm9 = vcmask 1046534   ;;  %vm588_vm10 = vcmask 1047559  }
  0x13   : > { %723 = vmatprep.subr.bf16.mxu0 %v316_v4  ;;  %v784_v5 = vld [vmem:[%s251_s8] sm:$0xff]   ;;  %v785_v6 = vld [vmem:[%s251_s8 + $0x8] sm:$0xff]   ;;  %v786_v7 = vld [vmem:[%s251_s8 + $0x10] sm:$0xff]   ;;  %s687_s17 = sshll.u32 %s258_s16, 3 }
  0x14   : > { %724 = vmatpush3.bf16.msra.mxu0 %v316_v4  ;;  %725 = vmatprep.mubr.msk.bf16.mxu0 %vm298_vm2, %v784_v5  ;;  %v787_v8 = vld [vmem:[%s251_s8 + $0x18] sm:$0xff]   ;;  %s260_s26 = scalar_lea.vmem %s941_s5, %s687_s17 }
  0x17   : > { %726 = vmatmul.mubr.msk.bf16.vlgmr.msra.gmra.mxu0 %vm298_vm2, %v785_v6 }
  0x18   : > { %729 = vmatprep.mubr.msk.bf16.mxu0 %vm298_vm2, %v786_v7 }
  0x1f   : > { %730 = vmatmul.mubr.msk.bf16.gmra.mxu0 %vm298_vm2, %v787_v8 }
  0xd7   : > { %v727_v10 = vpop.f32.mrf.mxu0 }
  0xd8   : > { %v361_v16 = vadd.f32 %v727_v10, %v688_v12 }
  0xd9   : > { %v352_v11 = vpop.f32.mrf.mxu0 }
  0xda   : > { %v353_v14 = vadd.f32 %v688_v12, %v352_v11  ;;  %v385_v23 = vmax.f32 %v361_v16, 0.0 }
  0xdb   : > { %v728_v13 = vpop.f32.mrf.mxu0 }
  0xdc   : > { %v364_v15 = vadd.f32 %v728_v13, %v688_v12  ;;  %v383_v21 = vmax.f32 %v353_v14, 0.0 }
  0xdd   : > { %v355_v17 = vpop.f32.mrf.mxu0 }
  0xde   : > { %v356_v18 = vadd.f32 %v688_v12, %v355_v17  ;;  %v386_v19 = vmax.f32 %v364_v15, 0.0 }
  0xdf   : > { %v731_v20 = vpop.f32.mrf.mxu0 }
  0xe0   : > { %v384_v22 = vmax.f32 %v356_v18, 0.0  ;;  %v710_v26 = vpack.c.bf16 %v386_v19, %v385_v23  ;;  %v377_v30 = vadd.f32 %v731_v20, %v688_v12 }
  0xe1   : > { %v368_v24 = vpop.f32.mrf.mxu0 }
  0xe2   : > { %v709_v25 = vpack.c.bf16 %v384_v22, %v383_v21  ;;  %v369_v28 = vadd.f32 %v688_v12, %v368_v24  ;;  %v389_v36 = vmax.f32 %v377_v30, 0.0 }
  0xe3   : > { %v732_v27 = vpop.f32.mrf.mxu0 }
  0xe4   : > { %v380_v29 = vadd.f32 %v732_v27, %v688_v12  ;;  %735 = vmatprep.mubr.msk.bf16.mxu1 %vm434_vm3, %v709_v25  ;;  %v387_v34 = vmax.f32 %v369_v28, 0.0 }
  0xe5   : > { %v371_v31 = vpop.f32.mrf.mxu0  ;;  %736 = vmatmul.mubr.msk.bf16.vlgmr.msra.gmra.mxu1 %vm434_vm3, %v710_v26 }
  0xe6   : > { %v372_v32 = vadd.f32 %v688_v12, %v371_v31  ;;  %v390_v33 = vmax.f32 %v380_v29, 0.0 }
  0xe8   : > { %v388_v35 = vmax.f32 %v372_v32, 0.0  ;;  %v712_v38 = vpack.c.bf16 %v390_v33, %v389_v36 }
  0xea   : > { %v711_v37 = vpack.c.bf16 %v388_v35, %v387_v34 }
  0xec   : > { %739 = vmatprep.mubr.msk.bf16.mxu1 %vm434_vm3, %v711_v37 }
  0xed   : > { %740 = vmatmul.mubr.msk.bf16.gmra.mxu1 %vm434_vm3, %v712_v38 }
 0x1a5   : > { %v737_v40 = vpop.f32.mrf.mxu1 }
 0x1a6   : > { %v490_v41 = vadd.f32 %v737_v40, %v697_v39 }
 0x1a7   : > { %v481_v42 = vpop.f32.mrf.mxu1 }
 0x1a8   : > { %v514_v43 = vmax.f32 %v490_v41, 0.0  ;;  %v482_v44 = vadd.f32 %v697_v39, %v481_v42 }
 0x1a9   : > { %v738_v45 = vpop.f32.mrf.mxu1 }
 0x1aa   : > { %v532_v46 = vrot.slane %v514_v43, 4  ;;  %v512_v47 = vmax.f32 %v482_v44, 0.0  ;;  %v493_v48 = vadd.f32 %v738_v45, %v697_v39 }
 0x1ab   : > { %v484_v49 = vpop.f32.mrf.mxu1 }
 0x1ac   : > { %v533_v50 = vmax.f32 %v514_v43, %v532_v46  ;;  %v520_v51 = vrot.slane %v512_v47, 4  ;;  %v515_v52 = vmax.f32 %v493_v48, 0.0  ;;  %v485_v53 = vadd.f32 %v697_v39, %v484_v49 }
 0x1ad   : > { %v741_v54 = vpop.f32.mrf.mxu1 }
 0x1ae   : > { %v521_v55 = vmax.f32 %v512_v47, %v520_v51  ;;  %v538_v56 = vrot.slane %v515_v52, 4  ;;  %v513_v57 = vmax.f32 %v485_v53, 0.0  ;;  %v506_v58 = vadd.f32 %v741_v54, %v697_v39 }
 0x1af   : > { %v497_v59 = vpop.f32.mrf.mxu1  ;;  %v534_v60 = vrot.slane %v533_v50, 2 }
 0x1b0   : > { %v522_v61 = vrot.slane %v521_v55, 2  ;;  %v539_v62 = vmax.f32 %v515_v52, %v538_v56  ;;  %v526_v63 = vrot.slane %v513_v57, 4  ;;  %v518_v0 = vmax.f32 %v506_v58, 0.0 }
 0x1b1   : > { %v498_v1 = vadd.f32 %v697_v39, %v497_v59  ;;  %v742_v2 = vpop.f32.mrf.mxu1  ;;  %v535_v9 = vmax.f32 %v533_v50, %v534_v60 }
 0x1b2   : > { %v523_v3 = vmax.f32 %v521_v55, %v522_v61  ;;  %v527_v4 = vmax.f32 %v513_v57, %v526_v63  ;;  %v556_v5 = vrot.slane %v518_v0, 4  ;;  %v509_v7 = vadd.f32 %v742_v2, %v697_v39 }
 0x1b3   : > { %v516_v6 = vmax.f32 %v498_v1, 0.0  ;;  %v500_v8 = vpop.f32.mrf.mxu1  ;;  %v540_v10 = vrot.slane %v539_v62, 2  ;;  %v536_v21 = vrot.slane %v535_v9, 1 }
 0x1b4   : > { %v528_v11 = vrot.slane %v527_v4, 2  ;;  %v557_v12 = vmax.f32 %v518_v0, %v556_v5  ;;  %v519_v14 = vmax.f32 %v509_v7, 0.0  ;;  %v501_v15 = vadd.f32 %v697_v39, %v500_v8 }
 0x1b5   : > { %v544_v13 = vrot.slane %v516_v6, 4  ;;  %v524_v16 = vrot.slane %v523_v3, 1  ;;  %v541_v22 = vmax.f32 %v539_v62, %v540_v10  ;;  %v537_v35 = vmax.f32 %v535_v9, %v536_v21 }
 0x1b6   : > { %v529_v17 = vmax.f32 %v527_v4, %v528_v11  ;;  %v562_v19 = vrot.slane %v519_v14, 4  ;;  %v517_v20 = vmax.f32 %v501_v15, 0.0  ;;  %v558_v24 = vrot.slane %v557_v12, 2 }
 0x1b7   : > { %v545_v18 = vmax.f32 %v516_v6, %v544_v13  ;;  %v525_v28 = vmax.f32 %v523_v3, %v524_v16  ;;  %v542_v33 = vrot.slane %v541_v22, 1 }
 0x1b8   : > { %v530_v23 = vrot.slane %v529_v17, 1  ;;  %v563_v26 = vmax.f32 %v519_v14, %v562_v19  ;;  %v550_v27 = vrot.slane %v517_v20, 4  ;;  %v559_v36 = vmax.f32 %v557_v12, %v558_v24 }
 0x1b9   : > { %v546_v25 = vrot.slane %v545_v18, 2  ;;  %v543_v41 = vmax.f32 %v541_v22, %v542_v33 }
 0x1ba   : > { %v531_v29 = vmax.f32 %v529_v17, %v530_v23  ;;  %v564_v31 = vrot.slane %v563_v26, 2  ;;  %v551_v32 = vmax.f32 %v517_v20, %v550_v27  ;;  %v560_v43 = vrot.slane %v559_v36, 1 }
 0x1bb   : > { %v547_v30 = vmax.f32 %v545_v18, %v546_v25 }
 0x1bc   : > { %v577_v34 = vsel %vm576_vm4, %v531_v29, %v525_v28  ;;  %v565_v38 = vmax.f32 %v563_v26, %v564_v31  ;;  %v552_v39 = vrot.slane %v551_v32, 2  ;;  %v561_v49 = vmax.f32 %v559_v36, %v560_v43 }
 0x1bd   : > { %v548_v37 = vrot.slane %v547_v30, 1  ;;  %v579_v40 = vsel %vm578_vm5, %v537_v35, %v577_v34 }
 0x1be   : > { %v553_v42 = vmax.f32 %v551_v32, %v552_v39  ;;  %v581_v45 = vsel %vm580_vm6, %v543_v41, %v579_v40  ;;  %v566_v46 = vrot.slane %v565_v38, 1 }
 0x1bf   : > { %v549_v44 = vmax.f32 %v547_v30, %v548_v37 }
 0x1c0   : > { %v554_v47 = vrot.slane %v553_v42, 1  ;;  %v567_v51 = vmax.f32 %v565_v38, %v566_v46 }
 0x1c1   : > { %v583_v50 = vsel %vm582_vm7, %v549_v44, %v581_v45 }
 0x1c2   : > { %v555_v48 = vmax.f32 %v553_v42, %v554_v47 }
 0x1c4   : > { %v585_v52 = vsel %vm584_vm8, %v555_v48, %v583_v50 }
 0x1c5   : > { %v587_v53 = vsel %vm586_vm9, %v561_v49, %v585_v52 }
 0x1c6   : > { %v589_v54 = vsel %vm588_vm10, %v567_v51, %v587_v53 }
 0x1c7   : > { %591 = vst [vmem:[%s260_s26] sm:$0xff] %v589_v54 }
 0x1c8 PF: > { %s15_s22 = sadd.s32 1, %s827_s22   ;;  %s942_s18 = smov %s819_s20 }
 0x1c9   : > { %p12_p8 = scmp.ge.s32.totalorder %s15_s22, 6   ;;  %s943_s19 = smov %s823_s21 }
 0x1ca   : > { %s944_s20 = smov %s947_s23  ;;  %s945_s21 = smov %s951_s24 }
 0x1cb   :  { %14 = sbr.rel (!%p12_p8) target bundleno = 3 (0x3), region = 70 }

</bundles_post_ra>
